<compile_context>
chip_gen: v6e
topology: v6e:2x2x1
jax: 0.10.0
libtpu: 0.0.40
codegen_flags: <defaults>
</compile_context>

<pallas_src>
import math
import jax
import jax.numpy as jnp
from jax.experimental import pallas as pl
from jax.experimental.pallas import tpu as pltpu


def _traj_pos_kernel(x_ref, traj_ref, scales_ref, shared_ref, wx_ref, wt_ref, o_ref):
    """One (TB, TS) tile of (batch, seq).

    x_ref:      (TB, TS, D)           input-embedding tile
    traj_ref:   (TB, TS, D or D//2)   trajectories tile (only first D//2 lanes used)
    scales_ref: (TS, 1)               sigmoid(position_scales)            (precomputed)
    shared_ref: (TS, D)               pos + 0.3*(dirs@Wd + freqs@Wf + b)  (batch-invariant)
    wx_ref:     (D, D)                0.3 * proj-weight rows for input_embeddings
    wt_ref:     (D//2, D)             0.3 * proj-weight rows for scaled trajectories
    o_ref:      (TB, TS, D)

    NOTE: on partial seq tiles the padded rows of shared/scales contain
    undefined data; Pallas masks those rows on writeback, so the result is
    correct — do not "optimize" the masking away.
    """
    x = x_ref[...]                                      # (TB, TS, D)
    tb, ts, d = x.shape
    dh = wt_ref.shape[0]                                # D // 2

    # Only pull the used half of the traj block into vregs (static branch:
    # when the half-width is lane-aligned the BlockSpec already DMA'd only it).
    if traj_ref.shape[-1] == dh:
        traj = traj_ref[...]
    else:
        traj = traj_ref[:, :, :dh]
    scaled = traj * scales_ref[...][None, :, :]         # (TB, TS, D//2), f32 VPU mul

    # Fold batch into the matmul M dimension (M = TB*TS) for MXU occupancy and
    # cast operands to the matmul dtype (bf16 by default) while keeping the
    # f32 MXU accumulator / epilogue.
    mm_dtype = wx_ref.dtype
    xm = x.reshape(tb * ts, d).astype(mm_dtype)
    tm = scaled.reshape(tb * ts, dh).astype(mm_dtype)
    proj = jnp.dot(xm, wx_ref[...], preferred_element_type=jnp.float32)
    proj = proj + jnp.dot(tm, wt_ref[...], preferred_element_type=jnp.float32)

    # 0.3 is already folded into wx/wt/shared -> plain add + cast epilogue.
    o_ref[...] = (shared_ref[...][None, :, :]
                  + proj.reshape(tb, ts, d)).astype(o_ref.dtype)


def trajectory_aware_pos_embedding(input_embeddings, trajectories, params, *,
                                   tb=None, ts=None, matmul_dtype=jnp.bfloat16):
    B, S, D = input_embeddings.shape
    Dq, Dh = D // 4, D // 2
    out_dtype = input_embeddings.dtype

    pos_emb = params["position_embedding"][:S].astype(jnp.float32)   # positions = arange => slice
    if trajectories is None:
        # No-trajectory path is a pure broadcast; no kernel needed.
        return jnp.broadcast_to(pos_emb[None].astype(out_dtype), (B, S, D))

    W = params["proj_weight"]                                  # (2D, D)
    b = params["proj_bias"]                                    # (D,)
    # Fold the 0.3 scale into the weight slices used inside the kernel.
    wx = (0.3 * W[:D]).astype(matmul_dtype)                    # (D, D)     input slice
    wt = (0.3 * W[D + 2 * Dq:]).astype(matmul_dtype)           # (D//2, D)  traj slice
    wd = W[D:D + Dq]                                           # (D//4, D)  dirs slice
    wf = W[D + Dq:D + 2 * Dq]                                  # (D//4, D)  freqs slice

    dirs = params["trajectory_directions"][:S]                 # (S, D//4)
    freqs = params["trajectory_frequencies"][:S]               # (S, D//4)

    # Batch-invariant part of the projection hoisted out of the kernel
    # (tiny (S, D) precompute): shared = pos + 0.3 * (dirs @ Wd + freqs @ Wf + b)
    shared = (pos_emb + 0.3 * (dirs @ wd + freqs @ wf + b[None, :])).astype(jnp.float32)
    sig_scales = jax.nn.sigmoid(params["position_scales"][:S].astype(jnp.float32))[:, None]  # (S, 1)

    # Tiling: (seq-tile, batch-tile) grid, batch innermost so shared/scales
    # stay resident across batch steps.  Keep ts a multiple of 8 so the
    # in-kernel flatten is a layout no-op; target M = tb*ts ~ 1024.
    if ts is None:
        ts = S if S <= 256 else 256
    ts = min(ts, S)
    if ts < S and ts % 8:
        ts = max(8, (ts // 8) * 8)
    if tb is None:
        tb = max(1, min(B, max(1, 1024 // max(ts, 1))))
    tb = min(tb, B)

    # Only DMA the half of `trajectories` that is actually used, when the
    # half-width is lane-aligned (always true for realistic model dims).
    traj_last = Dh if Dh % 128 == 0 else D

    grid = (pl.cdiv(S, ts), pl.cdiv(B, tb))   # batch innermost

    # TODO(synk): for D >= 2048 add a third grid axis over the output-feature
    # dimension so the (D, D) weight tile fits v7x's 64 MiB VMEM budget.

    def _build(single_buffer_weights):
        wkw = {"pipeline_mode": pl.Buffered(1)} if single_buffer_weights else {}
        grid_spec = pltpu.PrefetchScalarGridSpec(
            num_scalar_prefetch=0,
            grid=grid,
            in_specs=[
                pl.BlockSpec((tb, ts, D), lambda si, bi: (bi, si, 0)),          # input_embeddings
                pl.BlockSpec((tb, ts, traj_last), lambda si, bi: (bi, si, 0)),  # trajectories (first half)
                pl.BlockSpec((ts, 1), lambda si, bi: (si, 0)),                  # sigmoid(position_scales)
                pl.BlockSpec((ts, D), lambda si, bi: (si, 0)),                  # shared (batch-invariant)
                pl.BlockSpec((D, D), lambda si, bi: (0, 0), **wkw),             # 0.3 * W[:D]
                pl.BlockSpec((Dh, D), lambda si, bi: (0, 0), **wkw),            # 0.3 * W[3D/2:]
            ],
            out_specs=pl.BlockSpec((tb, ts, D), lambda si, bi: (bi, si, 0)),
        )
        return pl.pallas_call(
            _traj_pos_kernel,
            out_shape=jax.ShapeDtypeStruct((B, S, D), out_dtype),
            grid_spec=grid_spec,
            compiler_params=pltpu.CompilerParams(
                dimension_semantics=("parallel", "parallel"),   # 2-TC sharding on v7x
                vmem_limit_bytes=48 * 1024 * 1024),
        )

    args = (input_embeddings, trajectories, sig_scales, shared, wx, wt)
    try:
        return _build(True)(*args)       # single-buffered constant weights
    except Exception:
        # Fallback if this jax build rejects pl.Buffered(1) on pallas_call specs.
        return _build(False)(*args)


def init_params(key, model_dim, max_seq_len):
    D = model_dim
    Dq = D // 4
    k1, k2, k3, k4 = jax.random.split(key, 4)
    bound = 1.0 / math.sqrt(2 * D)
    params = {
        "position_embedding": jax.random.normal(k1, (max_seq_len, D), jnp.float32),
        "proj_weight": jax.random.uniform(k2, (2 * D, D), jnp.float32, -bound, bound),
        "proj_bias": jax.random.uniform(k3, (D,), jnp.float32, -bound, bound),
        "trajectory_directions": jax.random.normal(k4, (max_seq_len, Dq), jnp.float32) * 0.1,
        "position_scales": jnp.ones((max_seq_len,), jnp.float32) * 0.5,
    }
    # Sinusoidal trajectory_frequencies buffer (deterministic, matches the PyTorch code).
    position = jnp.arange(max_seq_len, dtype=jnp.float32)[:, None]
    div_term = jnp.exp(jnp.arange(0, Dq, 2, dtype=jnp.float32) * -(math.log(10000.0) / Dq))
    freqs = jnp.zeros((max_seq_len, Dq), jnp.float32)
    freqs = freqs.at[:, 0::2].set(jnp.sin(position * div_term))
    freqs = freqs.at[:, 1::2].set(jnp.cos(position * div_term))
    params["trajectory_frequencies"] = freqs
    return params


def _reference(input_embeddings, trajectories, params):
    B, S, D = input_embeddings.shape
    pos_emb = params["position_embedding"][:S]
    dirs = jnp.broadcast_to(params["trajectory_directions"][:S][None], (B, S, D // 4))
    freqs = jnp.broadcast_to(params["trajectory_frequencies"][:S][None], (B, S, D // 4))
    scales = jax.nn.sigmoid(params["position_scales"][:S])
    scaled = trajectories * scales[None, :, None]
    tc = jnp.concatenate([dirs, freqs, scaled[:, :, :D // 2]], axis=-1)
    cat = jnp.concatenate([input_embeddings, tc], axis=-1)
    proj = cat @ params["proj_weight"] + params["proj_bias"]
    return pos_emb[None] + 0.3 * proj


if __name__ == "__main__":
    MAX_SEQ = 64
    key = jax.random.PRNGKey(0)
    kp, kx, kt, kx2, kt2, kp3, kx3, kt3 = jax.random.split(key, 8)

    # Case 1: small divisible shapes, f32 matmul path (bit-tight check).
    B, S, D = 2, 8, 32
    params = init_params(kp, D, MAX_SEQ)
    x = jax.random.normal(kx, (B, S, D), jnp.float32)
    traj = jax.random.normal(kt, (B, S, D), jnp.float32)
    out = jax.block_until_ready(
        trajectory_aware_pos_embedding(x, traj, params, matmul_dtype=jnp.float32))
    ref = _reference(x, traj, params)
    assert out.shape == (B, S, D)
    assert jnp.allclose(out, ref, atol=1e-5, rtol=1e-5), "mismatch vs reference (case 1, f32)"

    # Case 1b: default bf16 matmul operands (f32 accumulate) -> looser tolerance.
    out_bf16 = jax.block_until_ready(trajectory_aware_pos_embedding(x, traj, params))
    assert jnp.allclose(out_bf16, ref, atol=2e-2), "mismatch vs reference (case 1b, bf16 matmul)"

    # Case 2: seq length not divisible by the seq tile (partial-block masking), f32 path.
    B2, S2 = 2, 12
    x2 = jax.random.normal(kx2, (B2, S2, D), jnp.float32)
    traj2 = jax.random.normal(kt2, (B2, S2, D), jnp.float32)
    out2 = jax.block_until_ready(
        trajectory_aware_pos_embedding(x2, traj2, params, tb=1, ts=8,
                                       matmul_dtype=jnp.float32))
    ref2 = _reference(x2, traj2, params)
    assert jnp.allclose(out2, ref2, atol=1e-5, rtol=1e-5), "mismatch vs reference (case 2)"

    # Case 3: D//2 lane-aligned -> only the used half of `trajectories` is DMA'd.
    B3, S3, D3 = 2, 8, 256
    params3 = init_params(kp3, D3, MAX_SEQ)
    x3 = jax.random.normal(kx3, (B3, S3, D3), jnp.float32)
    traj3 = jax.random.normal(kt3, (B3, S3, D3), jnp.float32)
    out3 = jax.block_until_ready(
        trajectory_aware_pos_embedding(x3, traj3, params3, matmul_dtype=jnp.float32))
    ref3 = _reference(x3, traj3, params3)
    assert jnp.allclose(out3, ref3, atol=1e-3, rtol=1e-3), "mismatch vs reference (case 3)"

    # No-trajectory path (pure broadcast, no kernel).
    out_none = jax.block_until_ready(trajectory_aware_pos_embedding(x, None, params))
    assert out_none.shape == (B, S, D)

    print("KERNEL_OK")
</pallas_src>

<mosaic_0001>
module attributes {stable_mosaic.version = 11 : i64} {
  func.func @_traj_pos_kernel(%arg0: i32, %arg1: i32, %arg2: memref<2x8x32xf32, #tpu.memory_space<vmem>>, %arg3: memref<2x8x32xf32, #tpu.memory_space<vmem>>, %arg4: memref<8x1xf32, #tpu.memory_space<vmem>>, %arg5: memref<8x32xf32, #tpu.memory_space<vmem>>, %arg6: memref<32x32xf32, #tpu.memory_space<vmem>>, %arg7: memref<16x32xf32, #tpu.memory_space<vmem>>, %arg8: memref<2x8x32xf32, #tpu.memory_space<vmem>>) attributes {dimension_semantics = [#tpu.dimension_semantics<parallel>, #tpu.dimension_semantics<parallel>], iteration_bounds = array<i64: 1, 1>, scalar_prefetch = 0 : i64, scratch_operands = 0 : i64, tpu.core_type = #tpu.core_type<tc>, window_params = [{transform_indices = @transform_0, window_bounds = array<i64: 2, 8, 32>}, {transform_indices = @transform_1, window_bounds = array<i64: 2, 8, 32>}, {transform_indices = @transform_2, window_bounds = array<i64: 8, 1>}, {transform_indices = @transform_3, window_bounds = array<i64: 8, 32>}, {pipeline_mode = #tpu.pipeline_mode<synchronous>, transform_indices = @transform_4, window_bounds = array<i64: 32, 32>}, {pipeline_mode = #tpu.pipeline_mode<synchronous>, transform_indices = @transform_5, window_bounds = array<i64: 16, 32>}, {transform_indices = @transform_6, window_bounds = array<i64: 2, 8, 32>}]} {
    %c0 = arith.constant 0 : index
    %c0_0 = arith.constant 0 : index
    %c0_1 = arith.constant 0 : index
    %0 = vector.load %arg2[%c0, %c0_0, %c0_1] : memref<2x8x32xf32, #tpu.memory_space<vmem>>, vector<2x8x32xf32>
    %c0_2 = arith.constant 0 : index
    %c0_3 = arith.constant 0 : index
    %c0_4 = arith.constant 0 : index
    %1 = vector.load %arg3[%c0_2, %c0_3, %c0_4] : memref<2x8x32xf32, #tpu.memory_space<vmem>>, vector<2x8x16xf32>
    %c0_5 = arith.constant 0 : index
    %c0_6 = arith.constant 0 : index
    %2 = vector.load %arg4[%c0_5, %c0_6] : memref<8x1xf32, #tpu.memory_space<vmem>>, vector<8x1xf32>
    %3 = vector.shape_cast %2 : vector<8x1xf32> to vector<1x8x1xf32>
    %4 = vector.broadcast %3 : vector<1x8x1xf32> to vector<2x8x16xf32>
    %5 = arith.mulf %1, %4 : vector<2x8x16xf32>
    %6 = vector.shape_cast %0 : vector<2x8x32xf32> to vector<16x32xf32>
    %7 = vector.shape_cast %5 : vector<2x8x16xf32> to vector<16x16xf32>
    %c0_7 = arith.constant 0 : index
    %c0_8 = arith.constant 0 : index
    %8 = vector.load %arg6[%c0_7, %c0_8] : memref<32x32xf32, #tpu.memory_space<vmem>>, vector<32x32xf32>
    %cst = arith.constant dense<0.000000e+00> : vector<16x32xf32>
    %9 = tpu.matmul %6, %8, %cst {dimension_numbers = #tpu.dot_dimension_numbers<[1], [0], [0], [1], [0, 0, 1, 1], [], []>} : vector<16x32xf32>, vector<32x32xf32>, vector<16x32xf32> -> vector<16x32xf32>
    %c0_9 = arith.constant 0 : index
    %c0_10 = arith.constant 0 : index
    %10 = vector.load %arg7[%c0_9, %c0_10] : memref<16x32xf32, #tpu.memory_space<vmem>>, vector<16x32xf32>
    %cst_11 = arith.constant dense<0.000000e+00> : vector<16x32xf32>
    %11 = tpu.matmul %7, %10, %cst_11 {dimension_numbers = #tpu.dot_dimension_numbers<[1], [0], [0], [1], [0, 0, 1, 1], [], []>} : vector<16x16xf32>, vector<16x32xf32>, vector<16x32xf32> -> vector<16x32xf32>
    %12 = arith.addf %9, %11 : vector<16x32xf32>
    %c0_12 = arith.constant 0 : index
    %c0_13 = arith.constant 0 : index
    %13 = vector.load %arg5[%c0_12, %c0_13] : memref<8x32xf32, #tpu.memory_space<vmem>>, vector<8x32xf32>
    %14 = vector.shape_cast %13 : vector<8x32xf32> to vector<1x8x32xf32>
    %15 = vector.shape_cast %12 : vector<16x32xf32> to vector<2x8x32xf32>
    %16 = vector.broadcast %14 : vector<1x8x32xf32> to vector<2x8x32xf32>
    %17 = arith.addf %16, %15 : vector<2x8x32xf32>
    %c0_14 = arith.constant 0 : index
    %c0_15 = arith.constant 0 : index
    %c0_16 = arith.constant 0 : index
    %18 = vector.load %arg8[%c0_14, %c0_15, %c0_16] : memref<2x8x32xf32, #tpu.memory_space<vmem>>, vector<2x8x32xf32>
    tpu.vector_store %arg8[%c0_14, %c0_15, %c0_16], %17 {strides = array<i32>} : memref<2x8x32xf32, #tpu.memory_space<vmem>>, vector<2x8x32xf32>,
    return
  }
  func.func @transform_0(%arg0: i32, %arg1: i32) -> (i32, i32, i32) {
    %c0_i32 = arith.constant 0 : i32
    %c0_i32_0 = arith.constant 0 : i32
    return %arg1, %arg0, %c0_i32 : i32, i32, i32
  }
  func.func @transform_1(%arg0: i32, %arg1: i32) -> (i32, i32, i32) {
    %c0_i32 = arith.constant 0 : i32
    %c0_i32_0 = arith.constant 0 : i32
    return %arg1, %arg0, %c0_i32 : i32, i32, i32
  }
  func.func @transform_2(%arg0: i32, %arg1: i32) -> (i32, i32) {
    %c0_i32 = arith.constant 0 : i32
    %c0_i32_0 = arith.constant 0 : i32
    return %arg0, %c0_i32 : i32, i32
  }
  func.func @transform_3(%arg0: i32, %arg1: i32) -> (i32, i32) {
    %c0_i32 = arith.constant 0 : i32
    %c0_i32_0 = arith.constant 0 : i32
    return %arg0, %c0_i32 : i32, i32
  }
  func.func @transform_4(%arg0: i32, %arg1: i32) -> (i32, i32) {
    %c0_i32 = arith.constant 0 : i32
    %c0_i32_0 = arith.constant 0 : i32
    %c0_i32_1 = arith.constant 0 : i32
    return %c0_i32, %c0_i32_0 : i32, i32
  }
  func.func @transform_5(%arg0: i32, %arg1: i32) -> (i32, i32) {
    %c0_i32 = arith.constant 0 : i32
    %c0_i32_0 = arith.constant 0 : i32
    %c0_i32_1 = arith.constant 0 : i32
    return %c0_i32, %c0_i32_0 : i32, i32
  }
  func.func @transform_6(%arg0: i32, %arg1: i32) -> (i32, i32, i32) {
    %c0_i32 = arith.constant 0 : i32
    %c0_i32_0 = arith.constant 0 : i32
    return %arg1, %arg0, %c0_i32 : i32, i32, i32
  }
}

module attributes {stable_mosaic.version = 11 : i64} {
  func.func @_traj_pos_kernel(%arg0: i32, %arg1: i32, %arg2: memref<2x8x32xf32, #tpu.memory_space<vmem>>, %arg3: memref<2x8x32xf32, #tpu.memory_space<vmem>>, %arg4: memref<8x1xf32, #tpu.memory_space<vmem>>, %arg5: memref<8x32xf32, #tpu.memory_space<vmem>>, %arg6: memref<32x32xf32, #tpu.memory_space<vmem>>, %arg7: memref<16x32xf32, #tpu.memory_space<vmem>>, %arg8: memref<2x8x32xf32, #tpu.memory_space<vmem>>) attributes {dimension_semantics = [#tpu.dimension_semantics<parallel>, #tpu.dimension_semantics<parallel>], iteration_bounds = array<i64: 1, 1>, scalar_prefetch = 0 : i64, scratch_operands = 0 : i64, tpu.core_type = #tpu.core_type<tc>, window_params = [{transform_indices = @transform_0, window_bounds = array<i64: 2, 8, 32>}, {transform_indices = @transform_1, window_bounds = array<i64: 2, 8, 32>}, {transform_indices = @transform_2, window_bounds = array<i64: 8, 1>}, {transform_indices = @transform_3, window_bounds = array<i64: 8, 32>}, {pipeline_mode = #tpu.pipeline_mode<synchronous>, transform_indices = @transform_4, window_bounds = array<i64: 32, 32>}, {pipeline_mode = #tpu.pipeline_mode<synchronous>, transform_indices = @transform_5, window_bounds = array<i64: 16, 32>}, {transform_indices = @transform_6, window_bounds = array<i64: 2, 8, 32>}]} {
    %c0 = arith.constant 0 : index
    %c0_0 = arith.constant 0 : index
    %c0_1 = arith.constant 0 : index
    %0 = vector.load %arg2[%c0, %c0_0, %c0_1] : memref<2x8x32xf32, #tpu.memory_space<vmem>>, vector<2x8x32xf32>
    %c0_2 = arith.constant 0 : index
    %c0_3 = arith.constant 0 : index
    %c0_4 = arith.constant 0 : index
    %1 = vector.load %arg3[%c0_2, %c0_3, %c0_4] : memref<2x8x32xf32, #tpu.memory_space<vmem>>, vector<2x8x16xf32>
    %c0_5 = arith.constant 0 : index
    %c0_6 = arith.constant 0 : index
    %2 = vector.load %arg4[%c0_5, %c0_6] : memref<8x1xf32, #tpu.memory_space<vmem>>, vector<8x1xf32>
    %3 = vector.shape_cast %2 : vector<8x1xf32> to vector<1x8x1xf32>
    %4 = vector.broadcast %3 : vector<1x8x1xf32> to vector<2x8x16xf32>
    %5 = arith.mulf %1, %4 : vector<2x8x16xf32>
    %6 = vector.shape_cast %0 : vector<2x8x32xf32> to vector<16x32xf32>
    %7 = vector.shape_cast %5 : vector<2x8x16xf32> to vector<16x16xf32>
    %c0_7 = arith.constant 0 : index
    %c0_8 = arith.constant 0 : index
    %8 = vector.load %arg6[%c0_7, %c0_8] : memref<32x32xf32, #tpu.memory_space<vmem>>, vector<32x32xf32>
    %cst = arith.constant dense<0.000000e+00> : vector<16x32xf32>
    %9 = tpu.matmul %6, %8, %cst {dimension_numbers = #tpu.dot_dimension_numbers<[1], [0], [0], [1], [0, 0, 1, 1], [], []>} : vector<16x32xf32>, vector<32x32xf32>, vector<16x32xf32> -> vector<16x32xf32>
    %c0_9 = arith.constant 0 : index
    %c0_10 = arith.constant 0 : index
    %10 = vector.load %arg7[%c0_9, %c0_10] : memref<16x32xf32, #tpu.memory_space<vmem>>, vector<16x32xf32>
    %cst_11 = arith.constant dense<0.000000e+00> : vector<16x32xf32>
    %11 = tpu.matmul %7, %10, %cst_11 {dimension_numbers = #tpu.dot_dimension_numbers<[1], [0], [0], [1], [0, 0, 1, 1], [], []>} : vector<16x16xf32>, vector<16x32xf32>, vector<16x32xf32> -> vector<16x32xf32>
    %12 = arith.addf %9, %11 : vector<16x32xf32>
    %c0_12 = arith.constant 0 : index
    %c0_13 = arith.constant 0 : index
    %13 = vector.load %arg5[%c0_12, %c0_13] : memref<8x32xf32, #tpu.memory_space<vmem>>, vector<8x32xf32>
    %14 = vector.shape_cast %13 : vector<8x32xf32> to vector<1x8x32xf32>
    %15 = vector.shape_cast %12 : vector<16x32xf32> to vector<2x8x32xf32>
    %16 = vector.broadcast %14 : vector<1x8x32xf32> to vector<2x8x32xf32>
    %17 = arith.addf %16, %15 : vector<2x8x32xf32>
    %c0_14 = arith.constant 0 : index
    %c0_15 = arith.constant 0 : index
    %c0_16 = arith.constant 0 : index
    %18 = vector.load %arg8[%c0_14, %c0_15, %c0_16] : memref<2x8x32xf32, #tpu.memory_space<vmem>>, vector<2x8x32xf32>
    tpu.vector_store %arg8[%c0_14, %c0_15, %c0_16], %17 {strides = array<i32>} : memref<2x8x32xf32, #tpu.memory_space<vmem>>, vector<2x8x32xf32>,
    return
  }
  func.func @transform_0(%arg0: i32, %arg1: i32) -> (i32, i32, i32) {
    %c0_i32 = arith.constant 0 : i32
    %c0_i32_0 = arith.constant 0 : i32
    return %arg1, %arg0, %c0_i32 : i32, i32, i32
  }
  func.func @transform_1(%arg0: i32, %arg1: i32) -> (i32, i32, i32) {
    %c0_i32 = arith.constant 0 : i32
    %c0_i32_0 = arith.constant 0 : i32
    return %arg1, %arg0, %c0_i32 : i32, i32, i32
  }
  func.func @transform_2(%arg0: i32, %arg1: i32) -> (i32, i32) {
    %c0_i32 = arith.constant 0 : i32
    %c0_i32_0 = arith.constant 0 : i32
    return %arg0, %c0_i32 : i32, i32
  }
  func.func @transform_3(%arg0: i32, %arg1: i32) -> (i32, i32) {
    %c0_i32 = arith.constant 0 : i32
    %c0_i32_0 = arith.constant 0 : i32
    return %arg0, %c0_i32 : i32, i32
  }
  func.func @transform_4(%arg0: i32, %arg1: i32) -> (i32, i32) {
    %c0_i32 = arith.constant 0 : i32
    %c0_i32_0 = arith.constant 0 : i32
    %c0_i32_1 = arith.constant 0 : i32
    return %c0_i32, %c0_i32_0 : i32, i32
  }
  func.func @transform_5(%arg0: i32, %arg1: i32) -> (i32, i32) {
    %c0_i32 = arith.constant 0 : i32
    %c0_i32_0 = arith.constant 0 : i32
    %c0_i32_1 = arith.constant 0 : i32
    return %c0_i32, %c0_i32_0 : i32, i32
  }
  func.func @transform_6(%arg0: i32, %arg1: i32) -> (i32, i32, i32) {
    %c0_i32 = arith.constant 0 : i32
    %c0_i32_0 = arith.constant 0 : i32
    return %arg1, %arg0, %c0_i32 : i32, i32, i32
  }
}

</mosaic_0001>

<bundles_post_ra>
// kernel: tpu_custom_call.1
= control target key start
LH: loop header
LB: loop body
LE: loop exit
PB: predicated region body
PF: predicated region fallthrough
CT: control target
= control target key end

     0   :  { %11 = vsyncpa [#allocation3], 0  ;;  %s515_s0 = inlined_call_operand.hbm [shape: f32[2,8,32], index: 0, kind: input, shape index: {}]   ;;  %s516_s1 = inlined_call_operand.hbm [shape: f32[2,8,32], index: 1, kind: input, shape index: {}]   ;;  %s517_s2 = inlined_call_operand.vmem [shape: f32[8,1], index: 2, kind: input, shape index: {}]   ;;  %s518_s3 = inlined_call_operand.hbm [shape: f32[8,32], index: 3, kind: input, shape index: {}]   ;;  %s519_s4 = inlined_call_operand.hbm [shape: f32[32,32], index: 4, kind: input, shape index: {}]   ;;  %s520_s5 = inlined_call_operand.vmem [shape: f32[16,32], index: 5, kind: input, shape index: {}]   ;;  %s521_s6 = inlined_call_operand.hbm [shape: f32[2,8,32], index: 6, kind: output, shape index: {}]  }
   0x1   :  { %12 = vsyncpa [#allocation6], 0 }
   0x2   :  { %13 = vsyncpa [#allocation9], 0 }
   0x3   :  { %14 = vsyncpa [#allocation4], 0  ;;  %s432_s21 = smov [#allocation5]   ;;  %s433_s23 = smov [#allocation2]  }
   0x4   :  { %s32_s22 = sshll.u32 %s432_s21, 4  ;;  %s20_s24 = sshll.u32 %s433_s23, 4  ;;  %s33_s22 = int_to_ptr.vmem [resolvable:$true] %s32_s22  ;;  %s21_s24 = int_to_ptr.vmem [resolvable:$true] %s20_s24 }
   0x5   :  { %s332_s25 = scalar_lea.vmem %s33_s22, 256  ;;  %p337_p1 = scmp.lt.s32.totalorder %s33_s22, %s33_s22 }
   0x6   :  { %p333_p0 = scmp.ne.s32.totalorder %s33_s22, %s332_s25  ;;  %p338_p2 = scmp.lt.s32.totalorder %s332_s25, %s332_s25 }
   0x8   :  { %p339_p3 = por %p338_p2, %p337_p1 }
   0xa   :  { %p340_p4 = pnand %p339_p3, %p333_p0 }
   0xc   :  { %343 = shalt.err (!%p340_p4)
}
   0xd   :  { %s434_s26 = smov 128   ;;  %s435_s27 = smov 8  }
   0xe   :  { %38 = dma.hbm_to_vmem [thread:$0]  %s516_s1, 256, %s33_s22, [#allocation6], %s434_s26, %s434_s26, %s435_s27  }
   0xf   :  { %s352_s30 = scalar_lea.vmem %s21_s24, 256  ;;  %p357_p6 = scmp.lt.s32.totalorder %s21_s24, %s21_s24 }
  0x10   :  { %p353_p5 = scmp.ne.s32.totalorder %s21_s24, %s352_s30  ;;  %p358_p7 = scmp.lt.s32.totalorder %s352_s30, %s352_s30 }
  0x12   :  { %p359_p8 = por %p358_p7, %p357_p6 }
  0x14   :  { %p360_p9 = pnand %p359_p8, %p353_p5 }
  0x16   :  { %363 = shalt.err (!%p360_p9)
}
  0x17   :  { %26 = dma.hbm_to_vmem [thread:$0]  %s515_s0, 256, %s21_s24, [#allocation3], %s434_s26, %s434_s26, %s435_s27  }
  0x18   :  { %s436_s9 = smov [#allocation7]   ;;  %s437_s11 = smov [#allocation8]  }
  0x19   :  { %s47_s10 = sshll.u32 %s436_s9, 4  ;;  %s56_s12 = sshll.u32 %s437_s11, 4  ;;  %s48_s10 = int_to_ptr.vmem [resolvable:$true] %s47_s10  ;;  %s57_s12 = int_to_ptr.vmem [resolvable:$true] %s56_s12 }
  0x1a   :  { %s372_s1 = scalar_lea.vmem %s48_s10, 128  ;;  %p377_p11 = scmp.lt.s32.totalorder %s48_s10, %s48_s10 }
  0x1b   :  { %p373_p10 = scmp.ne.s32.totalorder %s48_s10, %s372_s1  ;;  %p378_p12 = scmp.lt.s32.totalorder %s372_s1, %s372_s1 }
  0x1d   :  { %p379_p13 = por %p378_p12, %p377_p11 }
  0x1f   :  { %p380_p0 = pnand %p379_p13, %p373_p10 }
  0x21   :  { %383 = shalt.err (!%p380_p0)
}
  0x22   :  { %50 = dma.hbm_to_vmem [thread:$0]  %s518_s3, 128, %s48_s10, [#allocation6]  }
  0x23   :  { %s392_s15 = scalar_lea.vmem %s57_s12, 512  ;;  %p397_p2 = scmp.lt.s32.totalorder %s57_s12, %s57_s12 }
  0x24   :  { %p393_p1 = scmp.ne.s32.totalorder %s57_s12, %s392_s15  ;;  %p398_p3 = scmp.lt.s32.totalorder %s392_s15, %s392_s15 }
  0x26   :  { %p399_p4 = por %p398_p3, %p397_p2 }
  0x28   :  { %p400_p5 = pnand %p399_p4, %p393_p1 }
  0x2a   :  { %403 = shalt.err (!%p400_p5)
}
  0x2b   :  { %62 = dma.hbm_to_vmem [thread:$0]  %s519_s4, 512, %s57_s12, [#allocation9], %s434_s26, %s434_s26, %s435_s27  }
  0x2c   :  { %424 = dma.done.wait [#allocation3], 256  }
  0x2d   :  { %425 = vsyncadd [#allocation3], 4294967040 }
  0x2e   :  { %426 = dma.done.wait [#allocation6], 384  }
  0x2f   :  { %427 = vsyncadd [#allocation6], 4294966912 }
  0x30   :  { %428 = dma.done.wait [#allocation9], 512  }
  0x31   :  { %429 = vsyncadd [#allocation9], 4294966784  ;;  %v438_v0 = vmov 0   ;;  %v81_v1 = vld [vmem:[%s517_s2] sm:$0xff]  ;;  %v91_v3 = vld [vmem:[#allocation8 + $0x10] sm:$0xff]  ;;  %vm177_vm0 = vcmask 261120  }
  0x32   :  { %323 = vset.pattern.permute.xlu0 %v438_v0  ;;  %v92_v2 = vld [vmem:[#allocation8 + $0x18] sm:$0xff]  ;;  %v94_v4 = vld [vmem:[%s520_s5 + $0x8] sm:$0xff]  ;;  %v90_v5 = vld [vmem:[#allocation8 + $0x8] sm:$0xff]  ;;  %vm95_vm1 = vcmask 130048   ;;  %s439_s2 = smov [#allocation10]  }
  0x33   :  { %84 = vperm.xlu0 %323, %v81_v1   ;;  %304 = vmatprep.subr.mxu1 %v92_v2  ;;  %v77_v6 = vld [vmem:[#allocation2] sm:$0xff]  ;;  %v89_v8 = vld [vmem:[#allocation8] sm:$0xff]  ;;  %v79_v10 = vld [vmem:[#allocation5] sm:$0xff] }
  0x34   :  { %305 = vmatpush3.msra.mxu1 %v92_v2  ;;  %297 = vmatprep.subr.mxu0 %v94_v4  ;;  %v93_v7 = vld [vmem:[%s520_s5] sm:$0xff]  ;;  %v78_v9 = vld [vmem:[#allocation2 + $0x8] sm:$0xff]  ;;  %v80_v11 = vld [vmem:[#allocation5 + $0x8] sm:$0xff]  ;;  %s269_s5 = sshll.u32 %s439_s2, 4  ;;  %s270_s5 = int_to_ptr.vmem [resolvable:$true] %s269_s5 }
  0x35   :  { %306 = vmatprep.subr.mxu1 %v91_v3  ;;  %298 = vmatpush3.msra.mxu0 %v94_v4  ;;  %v259_v17 = vld [vmem:[#allocation7] sm:$0xff]  ;;  %s404_s21 = scalar_lea.vmem %s270_s5, 256  ;;  %p409_p7 = scmp.lt.s32.totalorder %s270_s5, %s270_s5 }
  0x36   :  { %307 = vmatpush3.msra.mxu1 %v91_v3  ;;  %312 = vmatprep.mubr.msk.f32.mxu1 %vm177_vm0, %v77_v6  ;;  %p405_p6 = scmp.ne.s32.totalorder %s270_s5, %s404_s21  ;;  %p410_p8 = scmp.lt.s32.totalorder %s404_s21, %s404_s21 }
  0x37   :  { %308 = vmatprep.subr.mxu1 %v90_v5  ;;  %299 = vmatprep.subr.mxu0 %v93_v7 }
  0x38   :  { %309 = vmatpush3.msra.mxu1 %v90_v5  ;;  %300 = vmatpush3.msra.mxu0 %v93_v7  ;;  %p411_p9 = por %p410_p8, %p409_p7 }
  0x39   :  { %310 = vmatprep.subr.mxu1 %v89_v8 }
  0x3a   :  { %311 = vmatpush3.msra.mxu1 %v89_v8  ;;  %p412_p10 = pnand %p411_p9, %p405_p6 }
  0x3b   :  { %313 = vmatmul.mubr.msk.f32.vlgmr.msra.gmra.mxu1 %vm177_vm0, %v78_v9 }
  0xae   :  { %v85_v12 = vpop.permute.xlu0 %84 }
  0xaf   :  { %v87_v13 = vmul.f32 %v85_v12, %v79_v10  ;;  %v88_v14 = vmul.f32 %v85_v12, %v80_v11 }
  0xb1   :  { %301 = vmatprep.mubr.msk.f32.mxu0 %vm95_vm1, %v87_v13 }
  0xb2   :  { %302 = vmatmul.mubr.msk.f32.vlgmr.msra.gmra.mxu0 %vm95_vm1, %v88_v14 }
  0xfb   :  { %v314_v15 = vpop.f32.mrf.mxu1 }
  0xfd   :  { %v250_v19 = vpop.f32.mrf.mxu1 }
 0x172   :  { %v303_v16 = vpop.f32.mrf.mxu0 }
 0x173   :  { %v256_v18 = vadd.f32 %v314_v15, %v303_v16 }
 0x174   :  { %v168_v20 = vpop.f32.mrf.mxu0 }
 0x175   :  { %v261_v21 = vadd.f32 %v259_v17, %v256_v18  ;;  %v251_v22 = vadd.f32 %v250_v19, %v168_v20 }
 0x177   :  { %263 = vst.msk [vmem:[#allocation10 + $0x8] sm:$0xff] %vm177_vm0, %v261_v21  ;;  %v260_v23 = vadd.f32 %v259_v17, %v251_v22 }
 0x179   :  { %262 = vst.msk [vmem:[#allocation10] sm:$0xff] %vm177_vm0, %v260_v23 }
 0x17a   :  { %415 = shalt.err (!%p412_p10)
}
 0x17b   :  { %275 = dma.vmem_to_hbm [thread:$0]  %s270_s5, 256, %s521_s6, [#allocation4], %s434_s26, %s434_s26, %s435_s27  }
 0x17c   :  { %430 = dma.done.wait [#allocation4], 256  }
 0x17d   :  { %431 = vsyncadd [#allocation4], 4294967040 }
 0x17e   :  { %279 = vsyncpa [#allocation3], 1 }
 0x17f   :  { %280 = vsyncpa [#allocation6], 1 }
 0x180   :  { %281 = vsyncpa [#allocation9], 1 }
 0x181   :  { %282 = vsyncpa [#allocation4], 1 }

// kernel: tpu_custom_call.1
= control target key start
LH: loop header
LB: loop body
LE: loop exit
PB: predicated region body
PF: predicated region fallthrough
CT: control target
= control target key end

     0   :  { %11 = vsyncpa [#allocation3], 0  ;;  %s515_s0 = inlined_call_operand.hbm [shape: f32[2,8,32], index: 0, kind: input, shape index: {}]   ;;  %s516_s1 = inlined_call_operand.hbm [shape: f32[2,8,32], index: 1, kind: input, shape index: {}]   ;;  %s517_s2 = inlined_call_operand.vmem [shape: f32[8,1], index: 2, kind: input, shape index: {}]   ;;  %s518_s3 = inlined_call_operand.hbm [shape: f32[8,32], index: 3, kind: input, shape index: {}]   ;;  %s519_s4 = inlined_call_operand.hbm [shape: f32[32,32], index: 4, kind: input, shape index: {}]   ;;  %s520_s5 = inlined_call_operand.vmem [shape: f32[16,32], index: 5, kind: input, shape index: {}]   ;;  %s521_s6 = inlined_call_operand.hbm [shape: f32[2,8,32], index: 6, kind: output, shape index: {}]  }
   0x1   :  { %12 = vsyncpa [#allocation6], 0 }
   0x2   :  { %13 = vsyncpa [#allocation9], 0 }
   0x3   :  { %14 = vsyncpa [#allocation4], 0  ;;  %s432_s21 = smov [#allocation5]   ;;  %s433_s23 = smov [#allocation2]  }
   0x4   :  { %s32_s22 = sshll.u32 %s432_s21, 4  ;;  %s20_s24 = sshll.u32 %s433_s23, 4  ;;  %s33_s22 = int_to_ptr.vmem [resolvable:$true] %s32_s22  ;;  %s21_s24 = int_to_ptr.vmem [resolvable:$true] %s20_s24 }
   0x5   :  { %s332_s25 = scalar_lea.vmem %s33_s22, 256  ;;  %p337_p1 = scmp.lt.s32.totalorder %s33_s22, %s33_s22 }
   0x6   :  { %p333_p0 = scmp.ne.s32.totalorder %s33_s22, %s332_s25  ;;  %p338_p2 = scmp.lt.s32.totalorder %s332_s25, %s332_s25 }
   0x8   :  { %p339_p3 = por %p338_p2, %p337_p1 }
   0xa   :  { %p340_p4 = pnand %p339_p3, %p333_p0 }
   0xc   :  { %343 = shalt.err (!%p340_p4)
}
   0xd   :  { %s434_s26 = smov 128   ;;  %s435_s27 = smov 8  }
   0xe   :  { %38 = dma.hbm_to_vmem [thread:$0]  %s516_s1, 256, %s33_s22, [#allocation6], %s434_s26, %s434_s26, %s435_s27  }
   0xf   :  { %s352_s30 = scalar_lea.vmem %s21_s24, 256  ;;  %p357_p6 = scmp.lt.s32.totalorder %s21_s24, %s21_s24 }
  0x10   :  { %p353_p5 = scmp.ne.s32.totalorder %s21_s24, %s352_s30  ;;  %p358_p7 = scmp.lt.s32.totalorder %s352_s30, %s352_s30 }
  0x12   :  { %p359_p8 = por %p358_p7, %p357_p6 }
  0x14   :  { %p360_p9 = pnand %p359_p8, %p353_p5 }
  0x16   :  { %363 = shalt.err (!%p360_p9)
}
  0x17   :  { %26 = dma.hbm_to_vmem [thread:$0]  %s515_s0, 256, %s21_s24, [#allocation3], %s434_s26, %s434_s26, %s435_s27  }
  0x18   :  { %s436_s9 = smov [#allocation7]   ;;  %s437_s11 = smov [#allocation8]  }
  0x19   :  { %s47_s10 = sshll.u32 %s436_s9, 4  ;;  %s56_s12 = sshll.u32 %s437_s11, 4  ;;  %s48_s10 = int_to_ptr.vmem [resolvable:$true] %s47_s10  ;;  %s57_s12 = int_to_ptr.vmem [resolvable:$true] %s56_s12 }
  0x1a   :  { %s372_s1 = scalar_lea.vmem %s48_s10, 128  ;;  %p377_p11 = scmp.lt.s32.totalorder %s48_s10, %s48_s10 }
  0x1b   :  { %p373_p10 = scmp.ne.s32.totalorder %s48_s10, %s372_s1  ;;  %p378_p12 = scmp.lt.s32.totalorder %s372_s1, %s372_s1 }
  0x1d   :  { %p379_p13 = por %p378_p12, %p377_p11 }
  0x1f   :  { %p380_p0 = pnand %p379_p13, %p373_p10 }
  0x21   :  { %383 = shalt.err (!%p380_p0)
}
  0x22   :  { %50 = dma.hbm_to_vmem [thread:$0]  %s518_s3, 128, %s48_s10, [#allocation6]  }
  0x23   :  { %s392_s15 = scalar_lea.vmem %s57_s12, 512  ;;  %p397_p2 = scmp.lt.s32.totalorder %s57_s12, %s57_s12 }
  0x24   :  { %p393_p1 = scmp.ne.s32.totalorder %s57_s12, %s392_s15  ;;  %p398_p3 = scmp.lt.s32.totalorder %s392_s15, %s392_s15 }
  0x26   :  { %p399_p4 = por %p398_p3, %p397_p2 }
  0x28   :  { %p400_p5 = pnand %p399_p4, %p393_p1 }
  0x2a   :  { %403 = shalt.err (!%p400_p5)
}
  0x2b   :  { %62 = dma.hbm_to_vmem [thread:$0]  %s519_s4, 512, %s57_s12, [#allocation9], %s434_s26, %s434_s26, %s435_s27  }
  0x2c   :  { %424 = dma.done.wait [#allocation3], 256  }
  0x2d   :  { %425 = vsyncadd [#allocation3], 4294967040 }
  0x2e   :  { %426 = dma.done.wait [#allocation6], 384  }
  0x2f   :  { %427 = vsyncadd [#allocation6], 4294966912 }
  0x30   :  { %428 = dma.done.wait [#allocation9], 512  }
  0x31   :  { %429 = vsyncadd [#allocation9], 4294966784  ;;  %v438_v0 = vmov 0   ;;  %v81_v1 = vld [vmem:[%s517_s2] sm:$0xff]  ;;  %v91_v3 = vld [vmem:[#allocation8 + $0x10] sm:$0xff]  ;;  %vm177_vm0 = vcmask 261120  }
  0x32   :  { %323 = vset.pattern.permute.xlu0 %v438_v0  ;;  %v92_v2 = vld [vmem:[#allocation8 + $0x18] sm:$0xff]  ;;  %v94_v4 = vld [vmem:[%s520_s5 + $0x8] sm:$0xff]  ;;  %v90_v5 = vld [vmem:[#allocation8 + $0x8] sm:$0xff]  ;;  %vm95_vm1 = vcmask 130048   ;;  %s439_s2 = smov [#allocation10]  }
  0x33   :  { %84 = vperm.xlu0 %323, %v81_v1   ;;  %304 = vmatprep.subr.mxu1 %v92_v2  ;;  %v77_v6 = vld [vmem:[#allocation2] sm:$0xff]  ;;  %v89_v8 = vld [vmem:[#allocation8] sm:$0xff]  ;;  %v79_v10 = vld [vmem:[#allocation5] sm:$0xff] }
  0x34   :  { %305 = vmatpush3.msra.mxu1 %v92_v2  ;;  %297 = vmatprep.subr.mxu0 %v94_v4  ;;  %v93_v7 = vld [vmem:[%s520_s5] sm:$0xff]  ;;  %v78_v9 = vld [vmem:[#allocation2 + $0x8] sm:$0xff]  ;;  %v80_v11 = vld [vmem:[#allocation5 + $0x8] sm:$0xff]  ;;  %s269_s5 = sshll.u32 %s439_s2, 4  ;;  %s270_s5 = int_to_ptr.vmem [resolvable:$true] %s269_s5 }
  0x35   :  { %306 = vmatprep.subr.mxu1 %v91_v3  ;;  %298 = vmatpush3.msra.mxu0 %v94_v4  ;;  %v259_v17 = vld [vmem:[#allocation7] sm:$0xff]  ;;  %s404_s21 = scalar_lea.vmem %s270_s5, 256  ;;  %p409_p7 = scmp.lt.s32.totalorder %s270_s5, %s270_s5 }
  0x36   :  { %307 = vmatpush3.msra.mxu1 %v91_v3  ;;  %312 = vmatprep.mubr.msk.f32.mxu1 %vm177_vm0, %v77_v6  ;;  %p405_p6 = scmp.ne.s32.totalorder %s270_s5, %s404_s21  ;;  %p410_p8 = scmp.lt.s32.totalorder %s404_s21, %s404_s21 }
  0x37   :  { %308 = vmatprep.subr.mxu1 %v90_v5  ;;  %299 = vmatprep.subr.mxu0 %v93_v7 }
  0x38   :  { %309 = vmatpush3.msra.mxu1 %v90_v5  ;;  %300 = vmatpush3.msra.mxu0 %v93_v7  ;;  %p411_p9 = por %p410_p8, %p409_p7 }
  0x39   :  { %310 = vmatprep.subr.mxu1 %v89_v8 }
  0x3a   :  { %311 = vmatpush3.msra.mxu1 %v89_v8  ;;  %p412_p10 = pnand %p411_p9, %p405_p6 }
  0x3b   :  { %313 = vmatmul.mubr.msk.f32.vlgmr.msra.gmra.mxu1 %vm177_vm0, %v78_v9 }
  0xae   :  { %v85_v12 = vpop.permute.xlu0 %84 }
  0xaf   :  { %v87_v13 = vmul.f32 %v85_v12, %v79_v10  ;;  %v88_v14 = vmul.f32 %v85_v12, %v80_v11 }
  0xb1   :  { %301 = vmatprep.mubr.msk.f32.mxu0 %vm95_vm1, %v87_v13 }
  0xb2   :  { %302 = vmatmul.mubr.msk.f32.vlgmr.msra.gmra.mxu0 %vm95_vm1, %v88_v14 }
  0xfb   :  { %v314_v15 = vpop.f32.mrf.mxu1 }
  0xfd   :  { %v250_v19 = vpop.f32.mrf.mxu1 }
 0x172   :  { %v303_v16 = vpop.f32.mrf.mxu0 }
 0x173   :  { %v256_v18 = vadd.f32 %v314_v15, %v303_v16 }
 0x174   :  { %v168_v20 = vpop.f32.mrf.mxu0 }
 0x175   :  { %v261_v21 = vadd.f32 %v259_v17, %v256_v18  ;;  %v251_v22 = vadd.f32 %v250_v19, %v168_v20 }
 0x177   :  { %263 = vst.msk [vmem:[#allocation10 + $0x8] sm:$0xff] %vm177_vm0, %v261_v21  ;;  %v260_v23 = vadd.f32 %v259_v17, %v251_v22 }
 0x179   :  { %262 = vst.msk [vmem:[#allocation10] sm:$0xff] %vm177_vm0, %v260_v23 }
 0x17a   :  { %415 = shalt.err (!%p412_p10)
}
 0x17b   :  { %275 = dma.vmem_to_hbm [thread:$0]  %s270_s5, 256, %s521_s6, [#allocation4], %s434_s26, %s434_s26, %s435_s27  }
 0x17c   :  { %430 = dma.done.wait [#allocation4], 256  }
 0x17d   :  { %431 = vsyncadd [#allocation4], 4294967040 }
 0x17e   :  { %279 = vsyncpa [#allocation3], 1 }
 0x17f   :  { %280 = vsyncpa [#allocation6], 1 }
 0x180   :  { %281 = vsyncpa [#allocation9], 1 }
 0x181   :  { %282 = vsyncpa [#allocation4], 1 }

</bundles_post_ra>
